<compile_context>
chip_gen: v7x
topology: tpu7x:2x2x1
jax: 0.10.0
libtpu: 0.0.40
codegen_flags: <defaults>
</compile_context>

<pallas_src>
import jax
import jax.numpy as jnp
from jax.experimental import pallas as pl
from jax.experimental.pallas import tpu as pltpu

INP = 784          # 28 * 28 (fc1 in_features)
INP_PAD = 896      # 7 * 128 : lane-dense K for the first GEMM
HID = 128          # fc1 out_features / fc2 in_features
OUT = 1            # fc2 out_features
OUT_PAD = 128      # lane-dense output stores; sliced back to 1 in the wrapper


def _discriminator_kernel(x_ref, w1_ref, b1_ref, w2_ref, b2_ref, out_ref):
    # fc1: (TB, 896)bf16 @ (896, 128)bf16 -> f32 accumulation on the MXU.
    h = jnp.dot(x_ref[...], w1_ref[...], preferred_element_type=jnp.float32)
    h = h + b1_ref[...]                       # f32 bias (broadcast (1,128))
    # LeakyReLU(0.2) in f32 on the VPU.
    h = jnp.where(h > 0, h, 0.2 * h)
    # fc2: (TB, 128)bf16 @ (128, 128)bf16 -> f32 (N padded to 128 lanes).
    o = jnp.dot(h.astype(jnp.bfloat16), w2_ref[...],
                preferred_element_type=jnp.float32)
    o = o + b2_ref[...]
    out_ref[...] = jax.nn.sigmoid(o).astype(out_ref.dtype)


def _round_up(n, m):
    return ((n + m - 1) // m) * m


def discriminator_forward(x, w1, b1, w2, b2):
    """x: (B, ...) with prod(...) == 784 (e.g. (B, 1, 28, 28)), float32.
    w1: (784, 128), b1: (128,), w2: (128, 1), b2: (1,), all float32
    (PyTorch weights stored transposed, i.e. (in_features, out_features)).
    Returns (B, 1) float32 = sigmoid(fc2(leaky_relu(fc1(x), 0.2)))."""
    B = x.shape[0]
    x2 = x.reshape(B, INP).astype(jnp.float32)

    # Batch tile: weights VMEM-resident across grid steps, x/out double-buffered.
    TB_MAX = 256
    if B <= TB_MAX:
        tb = _round_up(max(B, 1), 16)   # bf16 sublane packing friendly
        B_pad = tb
    else:
        tb = TB_MAX
        B_pad = _round_up(B, tb)

    # One-time padding / casting in the wrapper (hoisted out of the kernel).
    x_p = jnp.pad(x2, ((0, B_pad - B), (0, INP_PAD - INP))).astype(jnp.bfloat16)
    w1_p = jnp.pad(w1, ((0, INP_PAD - INP), (0, 0))).astype(jnp.bfloat16)
    b1_p = b1.reshape(1, HID).astype(jnp.float32)
    w2_p = jnp.pad(w2, ((0, 0), (0, OUT_PAD - OUT))).astype(jnp.bfloat16)
    b2_p = jnp.pad(b2.reshape(1, OUT),
                   ((0, 0), (0, OUT_PAD - OUT))).astype(jnp.float32)

    grid = (B_pad // tb,)

    out_padded = pl.pallas_call(
        _discriminator_kernel,
        out_shape=jax.ShapeDtypeStruct((B_pad, OUT_PAD), jnp.float32),
        grid=grid,
        in_specs=[
            pl.BlockSpec((tb, INP_PAD), lambda i: (i, 0)),      # x tile
            pl.BlockSpec((INP_PAD, HID), lambda i: (0, 0)),     # w1 (resident)
            pl.BlockSpec((1, HID), lambda i: (0, 0)),           # b1 (resident)
            pl.BlockSpec((HID, OUT_PAD), lambda i: (0, 0)),     # w2 (resident)
            pl.BlockSpec((1, OUT_PAD), lambda i: (0, 0)),       # b2 (resident)
        ],
        out_specs=pl.BlockSpec((tb, OUT_PAD), lambda i: (i, 0)),
        compiler_params=pltpu.CompilerParams(
            dimension_semantics=("parallel",)),
    )(x_p, w1_p, b1_p, w2_p, b2_p)

    # Drop batch padding and the lane padding of the single logit/probability.
    return out_padded[:B, :OUT]


def init_params(key):
    """PyTorch-style Linear init (U(-1/sqrt(fan_in), 1/sqrt(fan_in))), with
    weights stored transposed as (in_features, out_features), float32."""
    k1, k2, k3, k4 = jax.random.split(key, 4)
    bound1 = 1.0 / jnp.sqrt(INP)
    bound2 = 1.0 / jnp.sqrt(HID)
    w1 = jax.random.uniform(k1, (INP, HID), jnp.float32, -bound1, bound1)
    b1 = jax.random.uniform(k2, (HID,), jnp.float32, -bound1, bound1)
    w2 = jax.random.uniform(k3, (HID, OUT), jnp.float32, -bound2, bound2)
    b2 = jax.random.uniform(k4, (OUT,), jnp.float32, -bound2, bound2)
    return w1, b1, w2, b2


if __name__ == "__main__":
    key = jax.random.PRNGKey(0)
    k_params, k_x = jax.random.split(key)
    w1, b1, w2, b2 = init_params(k_params)

    B = 2
    x = jax.random.normal(k_x, (B, 1, 28, 28), jnp.float32)

    out = discriminator_forward(x, w1, b1, w2, b2)
    out = jax.block_until_ready(out)

    # Pure-JAX f32 reference of the same math.
    xf = x.reshape(B, INP)
    h_ref = xf @ w1 + b1
    h_ref = jnp.where(h_ref > 0, h_ref, 0.2 * h_ref)
    ref = jax.nn.sigmoid(h_ref @ w2 + b2.reshape(1, OUT))

    assert out.shape == (B, OUT)
    # Tolerance reflects the explicit bf16-operand / f32-accumulation policy.
    assert jnp.allclose(out, ref, atol=2e-2), "mismatch vs reference"

    print("KERNEL_OK")
</pallas_src>

<mosaic_0001>
module attributes {stable_mosaic.version = 11 : i64} {
  func.func @_discriminator_kernel(%arg0: i32, %arg1: memref<16x896xbf16, #tpu.memory_space<vmem>>, %arg2: memref<896x128xbf16, #tpu.memory_space<vmem>>, %arg3: memref<1x128xf32, #tpu.memory_space<vmem>>, %arg4: memref<128x128xbf16, #tpu.memory_space<vmem>>, %arg5: memref<1x128xf32, #tpu.memory_space<vmem>>, %arg6: memref<16x128xf32, #tpu.memory_space<vmem>>) attributes {dimension_semantics = [#tpu.dimension_semantics<parallel>], iteration_bounds = array<i64: 1>, scalar_prefetch = 0 : i64, scratch_operands = 0 : i64, tpu.core_type = #tpu.core_type<tc>, window_params = [{transform_indices = @transform_0, window_bounds = array<i64: 16, 896>}, {pipeline_mode = #tpu.pipeline_mode<synchronous>, transform_indices = @transform_1, window_bounds = array<i64: 896, 128>}, {pipeline_mode = #tpu.pipeline_mode<synchronous>, transform_indices = @transform_2, window_bounds = array<i64: 1, 128>}, {pipeline_mode = #tpu.pipeline_mode<synchronous>, transform_indices = @transform_3, window_bounds = array<i64: 128, 128>}, {pipeline_mode = #tpu.pipeline_mode<synchronous>, transform_indices = @transform_4, window_bounds = array<i64: 1, 128>}, {transform_indices = @transform_5, window_bounds = array<i64: 16, 128>}]} {
    %c0 = arith.constant 0 : index
    %c0_0 = arith.constant 0 : index
    %0 = vector.load %arg1[%c0, %c0_0] : memref<16x896xbf16, #tpu.memory_space<vmem>>, vector<16x896xbf16>
    %c0_1 = arith.constant 0 : index
    %c0_2 = arith.constant 0 : index
    %1 = vector.load %arg2[%c0_1, %c0_2] : memref<896x128xbf16, #tpu.memory_space<vmem>>, vector<896x128xbf16>
    %cst = arith.constant dense<0.000000e+00> : vector<16x128xf32>
    %2 = tpu.matmul %0, %1, %cst {dimension_numbers = #tpu.dot_dimension_numbers<[1], [0], [0], [1], [0, 0, 1, 1], [], []>} : vector<16x896xbf16>, vector<896x128xbf16>, vector<16x128xf32> -> vector<16x128xf32>
    %c0_3 = arith.constant 0 : index
    %c0_4 = arith.constant 0 : index
    %3 = vector.load %arg3[%c0_3, %c0_4] : memref<1x128xf32, #tpu.memory_space<vmem>>, vector<1x128xf32>
    %4 = vector.broadcast %3 : vector<1x128xf32> to vector<16x128xf32>
    %5 = arith.addf %2, %4 : vector<16x128xf32>
    %cst_5 = arith.constant 0.000000e+00 : f32
    %6 = vector.broadcast %cst_5 : f32 to vector<16x128xf32>
    %7 = arith.cmpf ogt, %5, %6 : vector<16x128xf32>
    %cst_6 = arith.constant 2.000000e-01 : f32
    %8 = vector.broadcast %cst_6 : f32 to vector<16x128xf32>
    %9 = arith.mulf %8, %5 : vector<16x128xf32>
    %10 = arith.select %7, %5, %9 : vector<16x128xi1>, vector<16x128xf32>
    %11 = arith.truncf %10 : vector<16x128xf32> to vector<16x128xbf16>
    %c0_7 = arith.constant 0 : index
    %c0_8 = arith.constant 0 : index
    %12 = vector.load %arg4[%c0_7, %c0_8] : memref<128x128xbf16, #tpu.memory_space<vmem>>, vector<128x128xbf16>
    %cst_9 = arith.constant dense<0.000000e+00> : vector<16x128xf32>
    %13 = tpu.matmul %11, %12, %cst_9 {dimension_numbers = #tpu.dot_dimension_numbers<[1], [0], [0], [1], [0, 0, 1, 1], [], []>} : vector<16x128xbf16>, vector<128x128xbf16>, vector<16x128xf32> -> vector<16x128xf32>
    %c0_10 = arith.constant 0 : index
    %c0_11 = arith.constant 0 : index
    %14 = vector.load %arg5[%c0_10, %c0_11] : memref<1x128xf32, #tpu.memory_space<vmem>>, vector<1x128xf32>
    %15 = vector.broadcast %14 : vector<1x128xf32> to vector<16x128xf32>
    %16 = arith.addf %13, %15 : vector<16x128xf32>
    %17 = arith.negf %16 : vector<16x128xf32>
    %18 = math.exp %17 : vector<16x128xf32>
    %cst_12 = arith.constant 1.000000e+00 : f32
    %19 = vector.broadcast %cst_12 : f32 to vector<16x128xf32>
    %20 = arith.addf %19, %18 : vector<16x128xf32>
    %21 = arith.divf %19, %20 : vector<16x128xf32>
    %c0_13 = arith.constant 0 : index
    %c0_14 = arith.constant 0 : index
    %22 = vector.load %arg6[%c0_13, %c0_14] : memref<16x128xf32, #tpu.memory_space<vmem>>, vector<16x128xf32>
    tpu.vector_store %arg6[%c0_13, %c0_14], %21 {strides = array<i32>} : memref<16x128xf32, #tpu.memory_space<vmem>>, vector<16x128xf32>,
    return
  }
  func.func @transform_0(%arg0: i32) -> (i32, i32) {
    %c0_i32 = arith.constant 0 : i32
    %c0_i32_0 = arith.constant 0 : i32
    return %arg0, %c0_i32 : i32, i32
  }
  func.func @transform_1(%arg0: i32) -> (i32, i32) {
    %c0_i32 = arith.constant 0 : i32
    %c0_i32_0 = arith.constant 0 : i32
    %c0_i32_1 = arith.constant 0 : i32
    return %c0_i32, %c0_i32_0 : i32, i32
  }
  func.func @transform_2(%arg0: i32) -> (i32, i32) {
    %c0_i32 = arith.constant 0 : i32
    %c0_i32_0 = arith.constant 0 : i32
    %c0_i32_1 = arith.constant 0 : i32
    return %c0_i32, %c0_i32_0 : i32, i32
  }
  func.func @transform_3(%arg0: i32) -> (i32, i32) {
    %c0_i32 = arith.constant 0 : i32
    %c0_i32_0 = arith.constant 0 : i32
    %c0_i32_1 = arith.constant 0 : i32
    return %c0_i32, %c0_i32_0 : i32, i32
  }
  func.func @transform_4(%arg0: i32) -> (i32, i32) {
    %c0_i32 = arith.constant 0 : i32
    %c0_i32_0 = arith.constant 0 : i32
    %c0_i32_1 = arith.constant 0 : i32
    return %c0_i32, %c0_i32_0 : i32, i32
  }
  func.func @transform_5(%arg0: i32) -> (i32, i32) {
    %c0_i32 = arith.constant 0 : i32
    %c0_i32_0 = arith.constant 0 : i32
    return %arg0, %c0_i32 : i32, i32
  }
}

</mosaic_0001>

<bundles_post_ra>
// kernel: tpu_custom_call.1
= control target key start
LH: loop header
LB: loop body
LE: loop exit
PB: predicated region body
PF: predicated region fallthrough
CT: control target
= control target key end

     0   :  { %10 = vsyncpa [#allocation3], 0  ;;  %s1386_s0 = inlined_call_operand.hbm [shape: bf16[16,896], index: 0, kind: input, shape index: {}]   ;;  %s1387_s1 = inlined_call_operand.hbm [shape: bf16[896,128], index: 1, kind: input, shape index: {}]   ;;  %s1388_s2 = inlined_call_operand.vmem [shape: f32[1,128], index: 2, kind: input, shape index: {}]   ;;  %s1389_s3 = inlined_call_operand.hbm [shape: bf16[128,128], index: 3, kind: input, shape index: {}]   ;;  %s1390_s4 = inlined_call_operand.vmem [shape: f32[1,128], index: 4, kind: input, shape index: {}]   ;;  %s1391_s5 = inlined_call_operand.hbm [shape: f32[16,128], index: 5, kind: output, shape index: {}]  }
   0x1   :  { %11 = vsyncpa [#allocation6], 0 }
   0x2   :  { %12 = vsyncpa [#allocation4], 0  ;;  %s1264_s18 = smov [#allocation5]   ;;  %s1170_s22 = scalar_lea.hbm %s1387_s1, 7168 }
   0x3   :  { %s30_s19 = sshll.u32 %s1264_s18, 4  ;;  %p1171_p0 = scmp.ne.s32.totalorder %s1387_s1, %s1170_s22  ;;  %s31_s19 = int_to_ptr.vmem [resolvable:$true] %s30_s19 }
   0x4   :  { %p1174_p1 = scmp.lt.u32.totalorder %s1170_s22, %s1387_s1 }
   0x6   :  { %p1176_p2 = pnand %p1174_p1, %p1171_p0 }
   0x8   :  { %1179 = shalt.err (!%p1176_p2)
}
   0x9   :  { %s1180_s27 = scalar_lea.vmem %s31_s19, 7168  ;;  %p1185_p4 = scmp.lt.s32.totalorder %s31_s19, %s31_s19 }
   0xa   :  { %p1181_p3 = scmp.ne.s32.totalorder %s31_s19, %s1180_s27  ;;  %p1186_p5 = scmp.lt.s32.totalorder %s1180_s27, %s1180_s27 }
   0xc   :  { %p1187_p6 = por %p1186_p5, %p1185_p4 }
   0xe   :  { %p1188_p7 = pnand %p1187_p6, %p1181_p3 }
  0x10   :  { %1191 = shalt.err (!%p1188_p7)
}
  0x11   :  { %s1265_s28 = smov 64   ;;  %s1266_s29 = smov 4  }
  0x12   :  { %36 = dma.hbm_to_vmem [thread:$0]  %s1387_s1, 7168, %s31_s19, [#allocation6], %s1265_s28, %s1265_s28, %s1266_s29  }
  0x13   :  { %s1267_s7 = smov [#allocation2]   ;;  %s1192_s11 = scalar_lea.hbm %s1386_s0, 896 }
  0x14   :  { %s18_s8 = sshll.u32 %s1267_s7, 4  ;;  %p1193_p8 = scmp.ne.s32.totalorder %s1386_s0, %s1192_s11  ;;  %s19_s8 = int_to_ptr.vmem [resolvable:$true] %s18_s8 }
  0x15   :  { %p1196_p9 = scmp.lt.u32.totalorder %s1192_s11, %s1386_s0 }
  0x17   :  { %p1198_p10 = pnand %p1196_p9, %p1193_p8 }
  0x19   :  { %1201 = shalt.err (!%p1198_p10)
}
  0x1a   :  { %s1202_s16 = scalar_lea.vmem %s19_s8, 896  ;;  %p1207_p12 = scmp.lt.s32.totalorder %s19_s8, %s19_s8 }
  0x1b   :  { %p1203_p11 = scmp.ne.s32.totalorder %s19_s8, %s1202_s16  ;;  %p1208_p13 = scmp.lt.s32.totalorder %s1202_s16, %s1202_s16 }
  0x1d   :  { %p1209_p0 = por %p1208_p13, %p1207_p12 }
  0x1f   :  { %p1210_p1 = pnand %p1209_p0, %p1203_p11 }
  0x21   :  { %1213 = shalt.err (!%p1210_p1)
}
  0x22   :  { %s1268_s1 = smov 448   ;;  %s1269_s17 = smov 28  }
  0x23   :  { %24 = dma.hbm_to_vmem [thread:$0]  %s1386_s0, 896, %s19_s8, [#allocation3], %s1268_s1, %s1268_s1, %s1269_s17  }
  0x24   :  { %s1270_s20 = smov [#allocation7]   ;;  %s1214_s24 = scalar_lea.hbm %s1389_s3, 1024 }
  0x25   :  { %s44_s21 = sshll.u32 %s1270_s20, 4  ;;  %p1215_p2 = scmp.ne.s32.totalorder %s1389_s3, %s1214_s24  ;;  %s45_s21 = int_to_ptr.vmem [resolvable:$true] %s44_s21 }
  0x26   :  { %p1218_p3 = scmp.lt.u32.totalorder %s1214_s24, %s1389_s3 }
  0x28   :  { %p1220_p4 = pnand %p1218_p3, %p1215_p2 }
  0x2a   :  { %1223 = shalt.err (!%p1220_p4)
}
  0x2b   :  { %s1224_s6 = scalar_lea.vmem %s45_s21, 1024  ;;  %p1229_p6 = scmp.lt.s32.totalorder %s45_s21, %s45_s21 }
  0x2c   :  { %p1225_p5 = scmp.ne.s32.totalorder %s45_s21, %s1224_s6  ;;  %p1230_p7 = scmp.lt.s32.totalorder %s1224_s6, %s1224_s6 }
  0x2e   :  { %p1231_p8 = por %p1230_p7, %p1229_p6 }
  0x30   :  { %p1232_p9 = pnand %p1231_p8, %p1225_p5 }
  0x32   :  { %1235 = shalt.err (!%p1232_p9)
}
  0x33   :  { %50 = dma.hbm_to_vmem [thread:$0]  %s1389_s3, 1024, %s45_s21, [#allocation6], %s1265_s28, %s1265_s28, %s1266_s29  }
  0x34   :  { %1258 = dma.done.wait [#allocation3], 896  }
  0x35   :  { %1259 = vsyncadd [#allocation3], 4294966400 }
  0x36   :  { %1260 = dma.done.wait [#allocation6], 8192  }
  0x37   :  { %1261 = vsyncadd [#allocation6], 4294959104  ;;  %v1088_v0 = vld [vmem:[#allocation5 + $0x40] sm:$0xff]   ;;  %v1092_v4 = vld [vmem:[#allocation5 + $0x48] sm:$0xff]   ;;  %v1271_v38 = vmov 0.0   ;;  %vm1272_vm0 = vmmov 0  }
  0x38   :  { %v1089_v1 = vld [vmem:[#allocation5] sm:$0xff]   ;;  %952 = vmatprep.subr.bf16.mxu0 %v1088_v0  ;;  %v1093_v5 = vld [vmem:[#allocation5 + $0x8] sm:$0xff]   ;;  %v1096_v8 = vld [vmem:[#allocation5 + $0x50] sm:$0xff]   ;;  %s1273_s8 = smov [#allocation8]  }
  0x39   :  { %v1090_v2 = vld [vmem:[#allocation5 + $0xc0] sm:$0xff]   ;;  %953 = vmatpush3.bf16.msra.mxu0 %v1089_v1  ;;  %v1094_v6 = vld [vmem:[#allocation5 + $0xc8] sm:$0xff]   ;;  %v1097_v9 = vld [vmem:[#allocation5 + $0x10] sm:$0xff]   ;;  %s864_s9 = sshll.u32 %s1273_s8, 4  ;;  %s865_s9 = int_to_ptr.vmem [resolvable:$true] %s864_s9 }
  0x3a   :  { %v1091_v3 = vld [vmem:[#allocation5 + $0x80] sm:$0xff]   ;;  %974 = vmatprep.subr.bf16.mxu1 %v1090_v2  ;;  %954 = vmatprep.subr.bf16.mxu0 %v1092_v4  ;;  %v1095_v7 = vld [vmem:[#allocation5 + $0x88] sm:$0xff]   ;;  %v1098_v10 = vld [vmem:[#allocation5 + $0xd0] sm:$0xff]   ;;  %p1241_p11 = scmp.lt.s32.totalorder %s865_s9, %s865_s9 }
  0x3b   :  { %975 = vmatpush3.bf16.msra.mxu1 %v1091_v3  ;;  %v1099_v11 = vld [vmem:[#allocation5 + $0x90] sm:$0xff]   ;;  %v1100_v12 = vld [vmem:[#allocation5 + $0x58] sm:$0xff]   ;;  %v1104_v16 = vld [vmem:[#allocation5 + $0x60] sm:$0xff]  }
  0x3c   :  { %976 = vmatprep.subr.bf16.mxu1 %v1094_v6  ;;  %v1101_v13 = vld [vmem:[#allocation5 + $0x18] sm:$0xff]   ;;  %v1105_v17 = vld [vmem:[#allocation5 + $0x20] sm:$0xff]   ;;  %v1108_v20 = vld [vmem:[#allocation5 + $0x68] sm:$0xff]  }
  0x3d   :  { %955 = vmatpush3.bf16.msra.mxu0 %v1093_v5  ;;  %v1102_v14 = vld [vmem:[#allocation5 + $0xd8] sm:$0xff]   ;;  %v1106_v18 = vld [vmem:[#allocation5 + $0xe0] sm:$0xff]   ;;  %v1109_v21 = vld [vmem:[#allocation5 + $0x28] sm:$0xff]  }
  0x3e   :  { %956 = vmatprep.subr.bf16.mxu0 %v1096_v8  ;;  %v1103_v15 = vld [vmem:[#allocation5 + $0x98] sm:$0xff]   ;;  %v1107_v19 = vld [vmem:[#allocation5 + $0xa0] sm:$0xff]   ;;  %v1110_v22 = vld [vmem:[#allocation5 + $0xe8] sm:$0xff]  }
  0x3f   :  { %977 = vmatpush3.bf16.msra.mxu1 %v1095_v7  ;;  %v1111_v23 = vld [vmem:[#allocation5 + $0xa8] sm:$0xff]   ;;  %v1112_v24 = vld [vmem:[#allocation5 + $0x70] sm:$0xff]   ;;  %v1116_v28 = vld [vmem:[#allocation5 + $0x78] sm:$0xff]  }
  0x40   :  { %978 = vmatprep.subr.bf16.mxu1 %v1098_v10  ;;  %v1113_v25 = vld [vmem:[#allocation5 + $0x30] sm:$0xff]   ;;  %v1117_v29 = vld [vmem:[#allocation5 + $0x38] sm:$0xff]   ;;  %v1119_v31 = vld [vmem:[#allocation2] ss:$28 sps:$4 sm:$0xff]  }
  0x41   :  { %957 = vmatpush3.bf16.msra.mxu0 %v1097_v9  ;;  %v1114_v26 = vld [vmem:[#allocation5 + $0xf0] sm:$0xff]   ;;  %v1118_v30 = vld [vmem:[#allocation5 + $0xf8] sm:$0xff]   ;;  %v1121_v32 = vld [vmem:[#allocation2 + $0x4] ss:$28 sps:$4 sm:$0xff]  }
  0x42   :  { %958 = vmatprep.subr.bf16.mxu0 %v1100_v12  ;;  %v1115_v27 = vld [vmem:[#allocation5 + $0xb0] sm:$0xff]   ;;  %v1122_v33 = vld [vmem:[#allocation5 + $0xb8] sm:$0xff]   ;;  %594 = vmatprep.mubr.bf16.mxu0 %v1121_v32  ;;  %v1123_v34 = vld [vmem:[#allocation5 + $0x140] sm:$0xff]  }
  0x43   :  { %979 = vmatpush3.bf16.msra.mxu1 %v1099_v11  ;;  %v1124_v35 = vld [vmem:[#allocation2 + $0x8] ss:$28 sps:$4 sm:$0xff]   ;;  %v1127_v37 = vld [vmem:[#allocation5 + $0x100] sm:$0xff]   ;;  %v1135_v46 = vld [vmem:[#allocation5 + $0x158] sm:$0xff]  }
  0x44   :  { %980 = vmatprep.subr.bf16.mxu1 %v1102_v14  ;;  %v1126_v36 = vld [vmem:[#allocation2 + $0xc] ss:$28 sps:$4 sm:$0xff]   ;;  %v1128_v39 = vld [vmem:[#allocation5 + $0x180] sm:$0xff]   ;;  %v1129_v40 = vld [vmem:[#allocation5 + $0x148] sm:$0xff]  }
  0x45   :  { %959 = vmatpush3.bf16.msra.mxu0 %v1101_v13  ;;  %635 = vmatprep.mubr.bf16.mxu1 %v1126_v36  ;;  %v1130_v41 = vld [vmem:[#allocation5 + $0x108] sm:$0xff]   ;;  %v1132_v43 = vld [vmem:[#allocation5 + $0x150] sm:$0xff]   ;;  %v1136_v47 = vld [vmem:[#allocation5 + $0x118] sm:$0xff]  }
  0x46   :  { %960 = vmatprep.subr.bf16.mxu0 %v1104_v16  ;;  %v1131_v42 = vld [vmem:[#allocation5 + $0x188] sm:$0xff]   ;;  %v1133_v44 = vld [vmem:[#allocation5 + $0x110] sm:$0xff]   ;;  %v1137_v48 = vld [vmem:[#allocation5 + $0x198] sm:$0xff]  }
  0x47   :  { %981 = vmatpush3.bf16.msra.mxu1 %v1103_v15  ;;  %v1134_v45 = vld [vmem:[#allocation5 + $0x190] sm:$0xff]   ;;  %v1138_v49 = vld [vmem:[#allocation5 + $0x160] sm:$0xff]   ;;  %v1141_v52 = vld [vmem:[#allocation5 + $0x168] sm:$0xff]  }
  0x48   :  { %982 = vmatprep.subr.bf16.mxu1 %v1106_v18  ;;  %v1139_v50 = vld [vmem:[#allocation5 + $0x120] sm:$0xff]   ;;  %v1142_v53 = vld [vmem:[#allocation5 + $0x128] sm:$0xff]   ;;  %v1144_v55 = vld [vmem:[#allocation5 + $0x170] sm:$0xff]  }
  0x49   :  { %961 = vmatpush3.bf16.msra.mxu0 %v1105_v17  ;;  %v1140_v51 = vld [vmem:[#allocation5 + $0x1a0] sm:$0xff]   ;;  %v1143_v54 = vld [vmem:[#allocation5 + $0x1a8] sm:$0xff]   ;;  %v1145_v56 = vld [vmem:[#allocation5 + $0x130] sm:$0xff]  }
  0x4a   :  { %962 = vmatprep.subr.bf16.mxu0 %v1108_v20  ;;  %v1146_v57 = vld [vmem:[#allocation5 + $0x1b0] sm:$0xff]   ;;  %v1151_v58 = vld [vmem:[#allocation2 + $0x14] ss:$28 sps:$4 sm:$0xff]   ;;  %v1154_v0 = vld [vmem:[#allocation7] sm:$0xff]  }
  0x4b   :  { %983 = vmatpush3.bf16.msra.mxu1 %v1107_v19  ;;  %v1147_v59 = vld [vmem:[#allocation5 + $0x178] sm:$0xff]   ;;  %v1155_v1 = vld [vmem:[#allocation7 + $0x8] sm:$0xff]   ;;  %v1156_v2 = vld [vmem:[#allocation7 + $0x10] sm:$0xff]  }
  0x4c   :  { %984 = vmatprep.subr.bf16.mxu1 %v1110_v22  ;;  %v1148_v60 = vld [vmem:[#allocation5 + $0x138] sm:$0xff]   ;;  %v1158_v4 = vld [vmem:[#allocation7 + $0x20] sm:$0xff]   ;;  %v1159_v5 = vld [vmem:[#allocation7 + $0x28] sm:$0xff]  }
  0x4d   :  { %963 = vmatpush3.bf16.msra.mxu0 %v1109_v21  ;;  %v1152_v61 = vld [vmem:[#allocation5 + $0x1b8] sm:$0xff]   ;;  %v1160_v6 = vld [vmem:[#allocation7 + $0x30] sm:$0xff]   ;;  %v877_v9 = vld [vmem:[%s1388_s2] ss:$0 sm:$0xff] }
  0x4e   :  { %964 = vmatprep.subr.bf16.mxu0 %v1112_v24  ;;  %v1149_v62 = vld [vmem:[#allocation2 + $0x10] ss:$28 sps:$4 sm:$0xff]   ;;  %v1153_v63 = vld [vmem:[#allocation2 + $0x18] ss:$28 sps:$4 sm:$0xff]  }
  0x4f   :  { %985 = vmatpush3.bf16.msra.mxu1 %v1111_v23  ;;  %v1157_v3 = vld [vmem:[#allocation7 + $0x18] sm:$0xff]  }
  0x50   :  { %986 = vmatprep.subr.bf16.mxu1 %v1114_v26  ;;  %v1161_v7 = vld [vmem:[#allocation7 + $0x38] sm:$0xff]  }
  0x51   :  { %965 = vmatpush3.bf16.msra.mxu0 %v1113_v25 }
  0x52   :  { %966 = vmatprep.subr.bf16.mxu0 %v1116_v28 }
  0x53   :  { %987 = vmatpush3.bf16.msra.mxu1 %v1115_v27 }
  0x54   :  { %988 = vmatprep.subr.bf16.mxu1 %v1118_v30 }
  0x55   :  { %967 = vmatpush3.bf16.msra.mxu0 %v1117_v29 }
  0x56   :  { %996 = vmatprep.subr.bf16.mxu0 %v1123_v34 }
  0x57   :  { %989 = vmatpush3.bf16.msra.mxu1 %v1122_v33 }
  0x58   :  { %595 = vmatmul.mubr.bf16.vlgmr.msra.gmra.mrb[0].mxu0 %v1119_v31  ;;  %1036 = vmatprep.subr.bf16.mxu1 %v1271_v38 }
  0x59   :  { %997 = vmatpush3.bf16.msra.mxu0 %v1127_v37  ;;  %676 = vmatprep.mubr.bf16.mxu0 %v1151_v58 }
  0x5a   :  { %636 = vmatmul.mubr.bf16.vlgmr.msra.gmra.mrb[0].mxu1 %v1124_v35  ;;  %998 = vmatprep.subr.bf16.mxu0 %v1129_v40 }
  0x5b   :  { %1037 = vmatpush3.bf16.msra.mxu1 %v1128_v39  ;;  %1052 = vmatprep.mubr.msk.bf16.mxu1 %vm1272_vm0, %v1271_v38 }
  0x5c   :  { %1038 = vmatprep.subr.bf16.mxu1 %v1271_v38 }
  0x5d   :  { %999 = vmatpush3.bf16.msra.mxu0 %v1130_v41 }
  0x5e   :  { %1000 = vmatprep.subr.bf16.mxu0 %v1132_v43 }
  0x5f   :  { %1039 = vmatpush3.bf16.msra.mxu1 %v1131_v42 }
  0x60   :  { %1040 = vmatprep.subr.bf16.mxu1 %v1271_v38 }
  0x61   :  { %1001 = vmatpush3.bf16.msra.mxu0 %v1133_v44  ;;  %v941_v44 = vld [vmem:[%s1390_s4] ss:$0 sm:$0xff]  ;;  %s1236_s4 = scalar_lea.vmem %s865_s9, 256 }
  0x62   :  { %1002 = vmatprep.subr.bf16.mxu0 %v1135_v46  ;;  %p1237_p10 = scmp.ne.s32.totalorder %s865_s9, %s1236_s4  ;;  %p1242_p12 = scmp.lt.s32.totalorder %s1236_s4, %s1236_s4 }
  0x63   :  { %1041 = vmatpush3.bf16.msra.mxu1 %v1134_v45 }
  0x64   :  { %1042 = vmatprep.subr.bf16.mxu1 %v1271_v38  ;;  %p1243_p13 = por %p1242_p12, %p1241_p11 }
  0x65   :  { %1003 = vmatpush3.bf16.msra.mxu0 %v1136_v47 }
  0x66   :  { %1004 = vmatprep.subr.bf16.mxu0 %v1138_v49  ;;  %p1244_p0 = pnand %p1243_p13, %p1237_p10 }
  0x67   :  { %1043 = vmatpush3.bf16.msra.mxu1 %v1137_v48 }
  0x68   :  { %1044 = vmatprep.subr.bf16.mxu1 %v1271_v38 }
  0x69   :  { %1005 = vmatpush3.bf16.msra.mxu0 %v1139_v50 }
  0x6a   :  { %1006 = vmatprep.subr.bf16.mxu0 %v1141_v52 }
  0x6b   :  { %1045 = vmatpush3.bf16.msra.mxu1 %v1140_v51 }
  0x6c   :  { %1046 = vmatprep.subr.bf16.mxu1 %v1271_v38 }
  0x6d   :  { %1007 = vmatpush3.bf16.msra.mxu0 %v1142_v53 }
  0x6e   :  { %1008 = vmatprep.subr.bf16.mxu0 %v1144_v55 }
  0x6f   :  { %1047 = vmatpush3.bf16.msra.mxu1 %v1143_v54 }
  0x70   :  { %1048 = vmatprep.subr.bf16.mxu1 %v1271_v38 }
  0x71   :  { %1009 = vmatpush3.bf16.msra.mxu0 %v1145_v56 }
  0x72   :  { %1010 = vmatprep.subr.bf16.mxu0 %v1147_v59 }
  0x73   :  { %1049 = vmatpush3.bf16.msra.mxu1 %v1146_v57 }
  0x74   :  { %1050 = vmatprep.subr.bf16.mxu1 %v1271_v38 }
  0x75   :  { %1011 = vmatpush3.bf16.msra.mxu0 %v1148_v60 }
  0x76   :  { %1056 = vmatprep.subr.bf16.mxu0 %v1271_v38 }
  0x77   :  { %1051 = vmatpush3.bf16.msra.mxu1 %v1152_v61 }
  0x78   :  { %677 = vmatmul.mubr.bf16.vlgmr.msra.gmra.mrb[4].mxu0 %v1149_v62 }
  0x79   :  { %1072 = vmatprep.mubr.msk.bf16.mxu0 %vm1272_vm0, %v1271_v38  ;;  %1057 = vmatpush3.bf16.msra.mxu0 %v1154_v0 }
  0x7a   :  { %1053 = vmatmul.mubr.bf16.vlgmr.msra.gmra.mrb[4].mxu1 %v1153_v63  ;;  %1058 = vmatprep.subr.bf16.mxu0 %v1271_v38 }
  0x7d   :  { %1059 = vmatpush3.bf16.msra.mxu0 %v1155_v1 }
  0x7e   :  { %1060 = vmatprep.subr.bf16.mxu0 %v1271_v38 }
  0x81   :  { %1061 = vmatpush3.bf16.msra.mxu0 %v1156_v2 }
  0x82   :  { %1062 = vmatprep.subr.bf16.mxu0 %v1271_v38 }
  0x85   :  { %1063 = vmatpush3.bf16.msra.mxu0 %v1157_v3 }
  0x86   :  { %1064 = vmatprep.subr.bf16.mxu0 %v1271_v38 }
  0x89   :  { %1065 = vmatpush3.bf16.msra.mxu0 %v1158_v4 }
  0x8a   :  { %1066 = vmatprep.subr.bf16.mxu0 %v1271_v38 }
  0x8d   :  { %1067 = vmatpush3.bf16.msra.mxu0 %v1159_v5 }
  0x8e   :  { %1068 = vmatprep.subr.bf16.mxu0 %v1271_v38 }
  0x91   :  { %1069 = vmatpush3.bf16.msra.mxu0 %v1160_v6 }
  0x92   :  { %1070 = vmatprep.subr.bf16.mxu0 %v1271_v38 }
  0x95   :  { %1071 = vmatpush3.bf16.msra.mxu0 %v1161_v7 }
 0x12b   :  { %v968_v8 = vpop.f32.mrb[0].mxu0 }
 0x12c   :  { %v969_v10 = vpop.f32.mrb[1].mxu0 }
 0x12d   :  { %v970_v11 = vadd.f32 %v969_v10, %v968_v8  ;;  %v971_v12 = vpop.f32.mrb[2].mxu0  ;;  %v990_v13 = vpop.f32.mrb[0].mxu1 }
 0x12e   :  { %v972_v14 = vpop.f32.mrb[3].mxu0  ;;  %v991_v17 = vpop.f32.mrb[1].mxu1 }
 0x12f   :  { %v597_v15 = vadd.f32 %v970_v11, %v877_v9  ;;  %v973_v16 = vadd.f32 %v972_v14, %v971_v12  ;;  %v992_v18 = vadd.f32 %v991_v17, %v990_v13  ;;  %v993_v19 = vpop.f32.mrb[2].mxu1 }
 0x130   :  { %v994_v21 = vpop.f32.mrb[3].mxu1 }
 0x131   :  { %v600_v20 = vadd.f32 %v973_v16, %v877_v9  ;;  %v638_v22 = vadd.f32 %v992_v18, %v597_v15  ;;  %v995_v23 = vadd.f32 %v994_v21, %v993_v19 }
 0x133   :  { %v641_v24 = vadd.f32 %v995_v23, %v600_v20 }
 0x14b   :  { %v1012_v25 = vpop.f32.mrb[4].mxu0 }
 0x14c   :  { %v1013_v26 = vpop.f32.mrb[5].mxu0 }
 0x14d   :  { %v719_v27 = vpop.f32.mrb[4].mxu1  ;;  %v1014_v28 = vadd.f32 %v1013_v26, %v1012_v25  ;;  %v1015_v29 = vpop.f32.mrb[6].mxu0 }
 0x14e   :  { %v1054_v30 = vpop.f32.mrb[5].mxu1  ;;  %v1016_v31 = vpop.f32.mrb[7].mxu0 }
 0x14f   :  { %v722_v32 = vpop.f32.mrb[6].mxu1  ;;  %v679_v33 = vadd.f32 %v1014_v28, %v638_v22  ;;  %v1017_v34 = vadd.f32 %v1016_v31, %v1015_v29 }
 0x150   :  { %v1055_v35 = vpop.f32.mrb[7].mxu1 }
 0x151   :  { %v720_v36 = vadd.f32 %v719_v27, %v679_v33  ;;  %v682_v37 = vadd.f32 %v1017_v34, %v641_v24 }
 0x153   :  { %v728_v38 = vmul.f32 0.2, %v720_v36  ;;  %v723_v39 = vadd.f32 %v722_v32, %v682_v37  ;;  %vm726_vm1 = vcmp.gt.f32.partialorder %v720_v36, 0.0 }
 0x155   :  { %vm727_vm2 = vcmp.gt.f32.partialorder %v723_v39, 0.0  ;;  %v729_v40 = vmul.f32 0.2, %v723_v39  ;;  %v730_v41 = vsel %vm726_vm1, %v720_v36, %v728_v38 }
 0x157   :  { %v731_v42 = vsel %vm727_vm2, %v723_v39, %v729_v40 }
 0x158   :  { %v732_v43 = vpack.c.bf16 %v731_v42, %v730_v41 }
 0x15a   :  { %1073 = vmatmul.mubr.bf16.vlgmr.msra.gmra.mrb[8].mxu0 %v732_v43 }
 0x22d   :  { %v838_v45 = vpop.f32.mrb[8].mxu0 }
 0x22e   :  { %v839_v46 = vadd.f32 %v941_v44, %v838_v45  ;;  %v1074_v47 = vpop.f32.mrb[9].mxu0 }
 0x22f   :  { %v841_v48 = vpop.f32.mrb[10].mxu0 }
 0x230   :  { %v950_v49 = vmul.f32 -1.442695, %v839_v46  ;;  %v842_v50 = vadd.f32 %v941_v44, %v841_v48  ;;  %v1075_v51 = vpop.f32.mrb[11].mxu0 }
 0x232   :  { %1162 = vpow2.f32 %v950_v49  ;;  %v951_v52 = vmul.f32 -1.442695, %v842_v50 }
 0x234   :  { %1164 = vpow2.f32 %v951_v52 }
 0x23c   :  { %v1163_v53 = vpop.eup %1162 }
 0x23d   :  { %v851_v54 = vadd.f32 1.0, %v1163_v53 }
 0x23e   :  { %v1165_v55 = vpop.eup %1164 }
 0x23f   :  { %1166 = vrcp.f32 %v851_v54  ;;  %v852_v56 = vadd.f32 1.0, %v1165_v55 }
 0x241   :  { %1168 = vrcp.f32 %v852_v56 }
 0x249   :  { %v1167_v57 = vpop.eup %1166 }
 0x24a   :  { %857 = vst [vmem:[#allocation8] sm:$0xff] %v1167_v57 }
 0x24b   :  { %v1169_v58 = vpop.eup %1168 }
 0x24c   :  { %858 = vst [vmem:[#allocation8 + $0x8] sm:$0xff] %v1169_v58 }
 0x24d   :  { %1247 = shalt.err (!%p1244_p0)
}
 0x24e   :  { %s1248_s12 = scalar_lea.hbm %s1391_s5, 256 }
 0x24f   :  { %p1249_p1 = scmp.ne.s32.totalorder %s1391_s5, %s1248_s12  ;;  %p1252_p2 = scmp.lt.u32.totalorder %s1248_s12, %s1391_s5 }
 0x251   :  { %p1254_p3 = pnand %p1252_p2, %p1249_p1 }
 0x253   :  { %1257 = shalt.err (!%p1254_p3)
}
 0x254   :  { %s1274_s1 = smov 128   ;;  %s1275_s17 = smov 8  }
 0x255   :  { %870 = dma.vmem_to_hbm [thread:$0]  %s865_s9, 256, %s1391_s5, [#allocation4], %s1274_s1, %s1274_s1, %s1275_s17  }
 0x256   :  { %1262 = dma.done.wait [#allocation4], 256  }
 0x257   :  { %1263 = vsyncadd [#allocation4], 4294967040 }
 0x258   :  { %874 = vsyncpa [#allocation3], 1 }
 0x259   :  { %875 = vsyncpa [#allocation6], 1 }
 0x25a   :  { %876 = vsyncpa [#allocation4], 1 }

</bundles_post_ra>
